<compile_context>
chip_gen: v7x
topology: tpu7x:2x2x1
jax: 0.10.0
libtpu: 0.0.40
codegen_flags: <defaults>
</compile_context>

<pallas_src>
import math

import jax
import jax.numpy as jnp
from jax import lax
from jax.experimental import pallas as pl
from jax.experimental.pallas import tpu as pltpu


# contract the minor dims of both operands: A(M,K) . B(N,K)^T -> (M,N)
_NT_DIMS = (((1,), (1,)), ((), ()))


def _rup(n, m):
    return -(-n // m) * m


# ----------------------------------------------------------------------------
# Kernel
# ----------------------------------------------------------------------------
def phi_critic_kernel(x_ref, w14_ref, b14_ref, w2_ref, b2_ref, w5_ref, b5_ref,
                      o1_ref, o2_ref):
    """One batch tile.  Batch lives on the lane axis for h / y (lane-dense)."""
    hid = w2_ref.shape[1]

    # Fused layer 1 for both branches: hT = relu(W14 @ x^T + b14) -> (2*hid, block_b).
    # The NT dot_general contracts x's feature (minor) axis directly on the MXU,
    # so the batch-major x block never needs an explicit transpose.
    hT = lax.dot_general(w14_ref[...], x_ref[...], _NT_DIMS,
                         preferred_element_type=jnp.float32)
    hT = jnp.maximum(hT + b14_ref[...], 0.0)                     # f32, lane-dense

    # Layer 2: one small dense dot per branch (no block-diagonal zero work).
    act_dtype = w2_ref.dtype                                     # bf16 path casts h
    y1 = jnp.dot(w2_ref[...], hT[:hid].astype(act_dtype),
                 preferred_element_type=jnp.float32) + b2_ref[...]
    y2 = jnp.dot(w5_ref[...], hT[hid:].astype(act_dtype),
                 preferred_element_type=jnp.float32) + b5_ref[...]

    # (out, block_b) stores: batch on lanes -> full-width unmasked vector stores.
    o1_ref[...] = jnp.maximum(y1, 0.0).astype(o1_ref.dtype)
    o2_ref[...] = jnp.maximum(y2, 0.0).astype(o2_ref.dtype)


# ----------------------------------------------------------------------------
# Wrapper helpers
# ----------------------------------------------------------------------------
def _pack_params(p, mm_dtype):
    """PyTorch-layout weights (out_f, in_f) / biases (out_f,) -> kernel operands."""
    w14 = jnp.concatenate([p["w1"], p["w4"]], axis=0).astype(mm_dtype)       # (2*hid, inp)
    b14 = jnp.concatenate([p["b1"], p["b4"]], axis=0)[:, None].astype(jnp.float32)
    w2 = p["w2"].astype(mm_dtype)                                            # (out, hid)
    w5 = p["w5"].astype(mm_dtype)
    b2 = p["b2"][:, None].astype(jnp.float32)                                # (out, 1)
    b5 = p["b5"][:, None].astype(jnp.float32)
    return w14, b14, w2, b2, w5, b5


def _pick_block_b(B, inp, hid, out, itemsize=4, vmem_budget_bytes=16 << 20):
    """Batch tile: a multiple of 128 (output lane axis) or the full batch.

    Small problems run as ONE full-batch step (no forced grid>=2).  Large B gets
    the largest 128-multiple tile <= ~2048 that fits the padded-VMEM budget
    (>=512 rows reaches ~85% of HBM roofline on v6e, and grid>=2 lets v7x shard
    the parallel batch axis across its two TensorCores).  Non-divisible batches
    use a cdiv grid with a masked tail block instead of a tiny divisor tile.
    """
    # padded per-batch-element VMEM bytes (lane dim -> 128, sublane dim -> 8)
    per_elem = (2 * _rup(inp, 128) * itemsize                 # x block (double-buffered)
                + 2 * 2 * _rup(out, 8) * 4                    # two out blocks (double-buffered)
                + (_rup(2 * hid, 8) + 2 * _rup(out, 8)) * 4)  # hT / y1 / y2 temporaries
    cap = (vmem_budget_bytes // max(per_elem, 1)) // 128 * 128
    cap = max(128, min(2048, cap))
    if B <= cap:
        return B                                   # tiny/overhead-bound: single step
    if B % 128 == 0:
        divisors = [d for d in range(128, cap + 1, 128) if B % d == 0]
        if divisors and max(divisors) >= min(512, cap):
            return max(divisors)
    return cap                                     # cdiv grid, masked tail block


def _rep_spec(shape):
    """Replicated (constant index_map) parameter block; single-buffer if supported."""
    idx = lambda i: (0,) * len(shape)
    if hasattr(pl, "Buffered"):
        try:
            return pl.BlockSpec(shape, idx, pipeline_mode=pl.Buffered(1))
        except (TypeError, ValueError):
            pass
    return pl.BlockSpec(shape, idx)


# ----------------------------------------------------------------------------
# Forward
# ----------------------------------------------------------------------------
def phi_critic_deepset(x, params, *, block_b=None, transpose_outputs=True,
                       use_bf16_matmul=False):
    """x: (B, inp).  params: PyTorch-layout weights/biases.  Returns (x1, x2).

    By default the results match the PyTorch module exactly: two (B, out) f32
    arrays.  transpose_outputs=False returns the kernel's lane-major (out, B)
    slabs with zero extra copies (preferred for fused downstream consumers).
    """
    B, inp = x.shape
    hid = params["w1"].shape[0]
    out = params["w2"].shape[0]
    two_hid = 2 * hid
    out_dtype = x.dtype

    mm_dtype = jnp.bfloat16 if use_bf16_matmul else x.dtype
    mm_bytes = jnp.dtype(mm_dtype).itemsize
    out_bytes = jnp.dtype(out_dtype).itemsize

    # NOTE: in a real training loop pack once outside the step; it is trivial here.
    w14, b14, w2, b2, w5, b5 = _pack_params(params, mm_dtype)
    x_mm = x.astype(mm_dtype)

    if block_b is None:
        block_b = _pick_block_b(B, inp, hid, out, itemsize=mm_bytes)
    assert block_b == B or block_b % 128 == 0, \
        "batch tile must be a multiple of 128 (output lane axis) or the full batch"

    grid = (pl.cdiv(B, block_b),)

    in_specs = [
        pl.BlockSpec((block_b, inp), lambda i: (i, 0)),     # x (batch-major HBM layout)
        _rep_spec((two_hid, inp)), _rep_spec((two_hid, 1)),
        _rep_spec((out, hid)), _rep_spec((out, 1)),
        _rep_spec((out, hid)), _rep_spec((out, 1)),
    ]
    out_specs = (
        pl.BlockSpec((out, block_b), lambda i: (0, i)),     # lane-dense outputs
        pl.BlockSpec((out, block_b), lambda i: (0, i)),
    )
    out_shape = (jax.ShapeDtypeStruct((out, B), out_dtype),
                 jax.ShapeDtypeStruct((out, B), out_dtype))

    # Real traffic / flops so XLA schedules around the call sensibly.
    flops = 2 * B * (inp * two_hid + two_hid * out)
    bytes_accessed = ((B * inp + two_hid * inp + 2 * out * hid) * mm_bytes
                      + (two_hid + 2 * out) * 4
                      + 2 * B * out * out_bytes)

    # (8,128)-padding-aware VMEM estimate for this step.
    w_vmem = ((_rup(two_hid, 8) * _rup(inp, 128)
               + 2 * _rup(out, 8) * _rup(hid, 128)) * mm_bytes
              + (_rup(two_hid, 8) + 2 * _rup(out, 8)) * 128 * 4)         # biases
    est_vmem = (2 * block_b * _rup(inp, 128) * mm_bytes                  # x (2 buffers)
                + 2 * 2 * _rup(out, 8) * block_b * out_bytes             # y1/y2 (2 buffers)
                + (_rup(two_hid, 8) + 2 * _rup(out, 8)) * block_b * 4    # hT/y1/y2 temps
                + 2 * w_vmem                                             # params (<=2 bufs)
                + (2 << 20))                                             # headroom

    vmem_cap = 48 << 20   # stay well under v7x's 64 MiB physical VMEM per TensorCore
    try:
        info = pltpu.get_tpu_info()
        phys = getattr(info, "vmem_capacity_bytes", None)
        if phys:
            vmem_cap = min(vmem_cap, int(phys) * 3 // 4)
    except Exception:
        pass

    compiler_kwargs = dict(dimension_semantics=("parallel",))   # batch axis: v7x megacore
    if est_vmem > (16 << 20):
        compiler_kwargs["vmem_limit_bytes"] = int(min(est_vmem, vmem_cap))

    y1t, y2t = pl.pallas_call(
        phi_critic_kernel,
        out_shape=out_shape,
        grid_spec=pltpu.PrefetchScalarGridSpec(
            num_scalar_prefetch=0,
            grid=grid,
            in_specs=in_specs,
            out_specs=out_specs,
        ),
        compiler_params=pltpu.CompilerParams(**compiler_kwargs),
        cost_estimate=pl.CostEstimate(flops=flops, transcendentals=0,
                                      bytes_accessed=bytes_accessed),
    )(x_mm, w14, b14, w2, b2, w5, b5)

    if transpose_outputs:
        # Two tiny contiguous-slab transposes to match the PyTorch (B, out) layout.
        return y1t.T, y2t.T
    return y1t, y2t


# ----------------------------------------------------------------------------
# Init (matches torch xavier_uniform_ + zero bias) and pure-JAX reference
# ----------------------------------------------------------------------------
def xavier_uniform(key, fan_out, fan_in, dtype=jnp.float32):
    bound = math.sqrt(6.0 / (fan_in + fan_out))
    return jax.random.uniform(key, (fan_out, fan_in), dtype=dtype,
                              minval=-bound, maxval=bound)


def init_params(key, inp, hid, out, dtype=jnp.float32):
    k1, k2, k4, k5 = jax.random.split(key, 4)
    return {
        "w1": xavier_uniform(k1, hid, inp, dtype=dtype), "b1": jnp.zeros((hid,), dtype),
        "w2": xavier_uniform(k2, out, hid, dtype=dtype), "b2": jnp.zeros((out,), dtype),
        "w4": xavier_uniform(k4, hid, inp, dtype=dtype), "b4": jnp.zeros((hid,), dtype),
        "w5": xavier_uniform(k5, out, hid, dtype=dtype), "b5": jnp.zeros((out,), dtype),
    }


def reference_forward(x, p):
    h1 = jax.nn.relu(x @ p["w1"].T + p["b1"])
    x1 = jax.nn.relu(h1 @ p["w2"].T + p["b2"])
    h2 = jax.nn.relu(x @ p["w4"].T + p["b4"])
    x2 = jax.nn.relu(h2 @ p["w5"].T + p["b5"])
    return x1, x2


if __name__ == "__main__":
    key = jax.random.PRNGKey(0)
    kx, kp = jax.random.split(key)

    B, INP, HID, OUT = 128, 16, 32, 8   # Linear(inp, hid) -> Linear(hid, out), two branches
    x = jax.random.normal(kx, (B, INP), dtype=jnp.float32)
    params = init_params(kp, INP, HID, OUT)

    r1, r2 = reference_forward(x, params)

    # Default path: PyTorch-shaped (B, out) outputs, exact f32 math.
    x1, x2 = phi_critic_deepset(x, params)
    jax.block_until_ready((x1, x2))
    assert x1.shape == r1.shape == (B, OUT) and x2.shape == r2.shape
    assert jnp.allclose(x1, r1, atol=1e-5, rtol=1e-5)
    assert jnp.allclose(x2, r2, atol=1e-5, rtol=1e-5)

    # Lane-major (no-copy) outputs.
    y1t, y2t = phi_critic_deepset(x, params, transpose_outputs=False)
    jax.block_until_ready((y1t, y2t))
    assert y1t.shape == (OUT, B) and y2t.shape == (OUT, B)
    assert jnp.allclose(y1t.T, r1, atol=1e-5, rtol=1e-5)
    assert jnp.allclose(y2t.T, r2, atol=1e-5, rtol=1e-5)

    # Optional bf16 MXU path (f32 accumulation); loose tolerance.
    b1_, b2_ = phi_critic_deepset(x, params, use_bf16_matmul=True)
    jax.block_until_ready((b1_, b2_))
    assert jnp.allclose(b1_, r1, atol=1e-1, rtol=1e-1)
    assert jnp.allclose(b2_, r2, atol=1e-1, rtol=1e-1)

    print("KERNEL_OK")
</pallas_src>

<mosaic_0001>
module attributes {stable_mosaic.version = 11 : i64} {
  func.func @phi_critic_kernel(%arg0: i32, %arg1: memref<128x16xf32, #tpu.memory_space<vmem>>, %arg2: memref<64x16xf32, #tpu.memory_space<vmem>>, %arg3: memref<64x1xf32, #tpu.memory_space<vmem>>, %arg4: memref<8x32xf32, #tpu.memory_space<vmem>>, %arg5: memref<8x1xf32, #tpu.memory_space<vmem>>, %arg6: memref<8x32xf32, #tpu.memory_space<vmem>>, %arg7: memref<8x1xf32, #tpu.memory_space<vmem>>, %arg8: memref<8x128xf32, #tpu.memory_space<vmem>>, %arg9: memref<8x128xf32, #tpu.memory_space<vmem>>) attributes {dimension_semantics = [#tpu.dimension_semantics<parallel>], iteration_bounds = array<i64: 1>, scalar_prefetch = 0 : i64, scratch_operands = 0 : i64, tpu.core_type = #tpu.core_type<tc>, window_params = [{transform_indices = @transform_0, window_bounds = array<i64: 128, 16>}, {pipeline_mode = #tpu.pipeline_mode<synchronous>, transform_indices = @transform_1, window_bounds = array<i64: 64, 16>}, {pipeline_mode = #tpu.pipeline_mode<synchronous>, transform_indices = @transform_2, window_bounds = array<i64: 64, 1>}, {pipeline_mode = #tpu.pipeline_mode<synchronous>, transform_indices = @transform_3, window_bounds = array<i64: 8, 32>}, {pipeline_mode = #tpu.pipeline_mode<synchronous>, transform_indices = @transform_4, window_bounds = array<i64: 8, 1>}, {pipeline_mode = #tpu.pipeline_mode<synchronous>, transform_indices = @transform_5, window_bounds = array<i64: 8, 32>}, {pipeline_mode = #tpu.pipeline_mode<synchronous>, transform_indices = @transform_6, window_bounds = array<i64: 8, 1>}, {transform_indices = @transform_7, window_bounds = array<i64: 8, 128>}, {transform_indices = @transform_8, window_bounds = array<i64: 8, 128>}]} {
    %c0 = arith.constant 0 : index
    %c0_0 = arith.constant 0 : index
    %0 = vector.load %arg2[%c0, %c0_0] : memref<64x16xf32, #tpu.memory_space<vmem>>, vector<64x16xf32>
    %c0_1 = arith.constant 0 : index
    %c0_2 = arith.constant 0 : index
    %1 = vector.load %arg1[%c0_1, %c0_2] : memref<128x16xf32, #tpu.memory_space<vmem>>, vector<128x16xf32>
    %cst = arith.constant dense<0.000000e+00> : vector<64x128xf32>
    %2 = tpu.matmul %0, %1, %cst {dimension_numbers = #tpu.dot_dimension_numbers<[1], [1], [0], [0], [0, 0, 1, 0], [], []>} : vector<64x16xf32>, vector<128x16xf32>, vector<64x128xf32> -> vector<64x128xf32>
    %c0_3 = arith.constant 0 : index
    %c0_4 = arith.constant 0 : index
    %3 = vector.load %arg3[%c0_3, %c0_4] : memref<64x1xf32, #tpu.memory_space<vmem>>, vector<64x1xf32>
    %4 = vector.broadcast %3 : vector<64x1xf32> to vector<64x128xf32>
    %5 = arith.addf %2, %4 : vector<64x128xf32>
    %cst_5 = arith.constant 0.000000e+00 : f32
    %6 = vector.broadcast %cst_5 : f32 to vector<64x128xf32>
    %7 = arith.maximumf %5, %6 : vector<64x128xf32>
    %c0_6 = arith.constant 0 : index
    %c0_7 = arith.constant 0 : index
    %8 = vector.load %arg4[%c0_6, %c0_7] : memref<8x32xf32, #tpu.memory_space<vmem>>, vector<8x32xf32>
    %9 = vector.extract_strided_slice %7 {offsets = [0, 0], sizes = [32, 128], strides = [1, 1]} : vector<64x128xf32> to vector<32x128xf32>
    %cst_8 = arith.constant dense<0.000000e+00> : vector<8x128xf32>
    %10 = tpu.matmul %8, %9, %cst_8 {dimension_numbers = #tpu.dot_dimension_numbers<[1], [0], [0], [1], [0, 0, 1, 1], [], []>} : vector<8x32xf32>, vector<32x128xf32>, vector<8x128xf32> -> vector<8x128xf32>
    %c0_9 = arith.constant 0 : index
    %c0_10 = arith.constant 0 : index
    %11 = vector.load %arg5[%c0_9, %c0_10] : memref<8x1xf32, #tpu.memory_space<vmem>>, vector<8x1xf32>
    %12 = vector.broadcast %11 : vector<8x1xf32> to vector<8x128xf32>
    %13 = arith.addf %10, %12 : vector<8x128xf32>
    %c0_11 = arith.constant 0 : index
    %c0_12 = arith.constant 0 : index
    %14 = vector.load %arg6[%c0_11, %c0_12] : memref<8x32xf32, #tpu.memory_space<vmem>>, vector<8x32xf32>
    %15 = vector.extract_strided_slice %7 {offsets = [32, 0], sizes = [32, 128], strides = [1, 1]} : vector<64x128xf32> to vector<32x128xf32>
    %cst_13 = arith.constant dense<0.000000e+00> : vector<8x128xf32>
    %16 = tpu.matmul %14, %15, %cst_13 {dimension_numbers = #tpu.dot_dimension_numbers<[1], [0], [0], [1], [0, 0, 1, 1], [], []>} : vector<8x32xf32>, vector<32x128xf32>, vector<8x128xf32> -> vector<8x128xf32>
    %c0_14 = arith.constant 0 : index
    %c0_15 = arith.constant 0 : index
    %17 = vector.load %arg7[%c0_14, %c0_15] : memref<8x1xf32, #tpu.memory_space<vmem>>, vector<8x1xf32>
    %18 = vector.broadcast %17 : vector<8x1xf32> to vector<8x128xf32>
    %19 = arith.addf %16, %18 : vector<8x128xf32>
    %cst_16 = arith.constant 0.000000e+00 : f32
    %20 = vector.broadcast %cst_16 : f32 to vector<8x128xf32>
    %21 = arith.maximumf %13, %20 : vector<8x128xf32>
    %c0_17 = arith.constant 0 : index
    %c0_18 = arith.constant 0 : index
    %22 = vector.load %arg8[%c0_17, %c0_18] : memref<8x128xf32, #tpu.memory_space<vmem>>, vector<8x128xf32>
    tpu.vector_store %arg8[%c0_17, %c0_18], %21 {strides = array<i32>} : memref<8x128xf32, #tpu.memory_space<vmem>>, vector<8x128xf32>,
    %cst_19 = arith.constant 0.000000e+00 : f32
    %23 = vector.broadcast %cst_19 : f32 to vector<8x128xf32>
    %24 = arith.maximumf %19, %23 : vector<8x128xf32>
    %c0_20 = arith.constant 0 : index
    %c0_21 = arith.constant 0 : index
    %25 = vector.load %arg9[%c0_20, %c0_21] : memref<8x128xf32, #tpu.memory_space<vmem>>, vector<8x128xf32>
    tpu.vector_store %arg9[%c0_20, %c0_21], %24 {strides = array<i32>} : memref<8x128xf32, #tpu.memory_space<vmem>>, vector<8x128xf32>,
    return
  }
  func.func @transform_0(%arg0: i32) -> (i32, i32) {
    %c0_i32 = arith.constant 0 : i32
    %c0_i32_0 = arith.constant 0 : i32
    return %arg0, %c0_i32 : i32, i32
  }
  func.func @transform_1(%arg0: i32) -> (i32, i32) {
    %c0_i32 = arith.constant 0 : i32
    %c0_i32_0 = arith.constant 0 : i32
    %c0_i32_1 = arith.constant 0 : i32
    return %c0_i32, %c0_i32_0 : i32, i32
  }
  func.func @transform_2(%arg0: i32) -> (i32, i32) {
    %c0_i32 = arith.constant 0 : i32
    %c0_i32_0 = arith.constant 0 : i32
    %c0_i32_1 = arith.constant 0 : i32
    return %c0_i32, %c0_i32_0 : i32, i32
  }
  func.func @transform_3(%arg0: i32) -> (i32, i32) {
    %c0_i32 = arith.constant 0 : i32
    %c0_i32_0 = arith.constant 0 : i32
    %c0_i32_1 = arith.constant 0 : i32
    return %c0_i32, %c0_i32_0 : i32, i32
  }
  func.func @transform_4(%arg0: i32) -> (i32, i32) {
    %c0_i32 = arith.constant 0 : i32
    %c0_i32_0 = arith.constant 0 : i32
    %c0_i32_1 = arith.constant 0 : i32
    return %c0_i32, %c0_i32_0 : i32, i32
  }
  func.func @transform_5(%arg0: i32) -> (i32, i32) {
    %c0_i32 = arith.constant 0 : i32
    %c0_i32_0 = arith.constant 0 : i32
    %c0_i32_1 = arith.constant 0 : i32
    return %c0_i32, %c0_i32_0 : i32, i32
  }
  func.func @transform_6(%arg0: i32) -> (i32, i32) {
    %c0_i32 = arith.constant 0 : i32
    %c0_i32_0 = arith.constant 0 : i32
    %c0_i32_1 = arith.constant 0 : i32
    return %c0_i32, %c0_i32_0 : i32, i32
  }
  func.func @transform_7(%arg0: i32) -> (i32, i32) {
    %c0_i32 = arith.constant 0 : i32
    %c0_i32_0 = arith.constant 0 : i32
    return %c0_i32, %arg0 : i32, i32
  }
  func.func @transform_8(%arg0: i32) -> (i32, i32) {
    %c0_i32 = arith.constant 0 : i32
    %c0_i32_0 = arith.constant 0 : i32
    return %c0_i32, %arg0 : i32, i32
  }
}

</mosaic_0001>

<bundles_post_ra>
// kernel: tpu_custom_call.1
= control target key start
LH: loop header
LB: loop body
LE: loop exit
PB: predicated region body
PF: predicated region fallthrough
CT: control target
= control target key end

     0   :  { %14 = vsyncpa [#allocation3], 0  ;;  %vm102_vm0 = vcmask 130048   ;;  %v723_v6 = vmov 0   ;;  %s956_s0 = inlined_call_operand.vmem [shape: f32[128,16], index: 0, kind: input, shape index: {}]   ;;  %s957_s1 = inlined_call_operand.vmem [shape: f32[64,16], index: 1, kind: input, shape index: {}]   ;;  %s958_s2 = inlined_call_operand.vmem [shape: f32[64,1], index: 2, kind: input, shape index: {}]   ;;  %s959_s3 = inlined_call_operand.vmem [shape: f32[8,32], index: 3, kind: input, shape index: {}]   ;;  %s960_s4 = inlined_call_operand.vmem [shape: f32[8,1], index: 4, kind: input, shape index: {}]   ;;  %s961_s5 = inlined_call_operand.vmem [shape: f32[8,32], index: 5, kind: input, shape index: {}]   ;;  %s962_s6 = inlined_call_operand.vmem [shape: f32[8,1], index: 6, kind: input, shape index: {}]   ;;  %s963_s7 = inlined_call_operand.hbm [shape: f32[8,128], index: 7, kind: output, shape index: {0}]   ;;  %s964_s8 = inlined_call_operand.hbm [shape: f32[8,128], index: 8, kind: output, shape index: {1}]  }
   0x1   :  { %v38_v0 = vld [vmem:[%s956_s0] sm:$0xff]  ;;  %v39_v1 = vld [vmem:[%s956_s0 + $0x8] sm:$0xff]  ;;  %v40_v2 = vld [vmem:[%s956_s0 + $0x10] sm:$0xff]  ;;  %673 = vset.pattern.permute.xlu0 %v723_v6  ;;  %674 = vset.pattern.permute.xlu1 %v723_v6 }
   0x2   :  { %v607_v3 = vpack.c.bf16 %v39_v1, %v38_v0  ;;  %vm785_vm1 = vmpackc.low %vm102_vm0, %vm102_vm0  ;;  %v41_v5 = vld [vmem:[%s956_s0 + $0x18] sm:$0xff]  ;;  %v30_v8 = vld [vmem:[%s957_s1] sm:$0xff] }
   0x3   :  { %v613_v7 = vpack.c.bf16 %v41_v5, %v40_v2  ;;  %v42_v9 = vld [vmem:[%s956_s0 + $0x20] sm:$0xff]  ;;  %v43_v10 = vld [vmem:[%s956_s0 + $0x28] sm:$0xff]  ;;  %573 = vmatprep.mubr.msk.f32.mxu0 %vm102_vm0, %v30_v8  ;;  %v56_v12 = vld [vmem:[%s958_s2 + $0x10] sm:$0xff] }
   0x4   :  { %609 = vmatprep.subr.msk.bf16.mxu0 %vm785_vm1, %v607_v3  ;;  %v54_v11 = vld [vmem:[%s958_s2] sm:$0xff]  ;;  %v619_v13 = vpack.c.bf16 %v43_v10, %v42_v9  ;;  %74 = vperm.xlu1 %674, %v56_v12   ;;  %v55_v14 = vld [vmem:[%s958_s2 + $0x8] sm:$0xff]  ;;  %v57_v15 = vld [vmem:[%s958_s2 + $0x18] sm:$0xff] }
   0x5   :  { %612 = vmatpush3.bf16.xpose.msk.msra.mxu0 %vm785_vm1, %v607_v3  ;;  %64 = vperm.xlu0 %673, %v54_v11  }
   0x6   :  { %615 = vmatprep.subr.msk.bf16.mxu0 %vm785_vm1, %v613_v7 }
   0x7   :  { %15 = vsyncpa [#allocation5], 0  ;;  %v44_v16 = vld [vmem:[%s956_s0 + $0x30] sm:$0xff]  ;;  %v45_v17 = vld [vmem:[%s956_s0 + $0x38] sm:$0xff]  ;;  %v724_v44 = vmov 0.0|0.0   ;;  %vm725_vm2 = vmmov 0  }
   0x8   :  { %79 = vperm.xlu1 %674, %v57_v15   ;;  %v58_v18 = vld [vmem:[%s958_s2 + $0x20] sm:$0xff]  ;;  %v59_v19 = vld [vmem:[%s958_s2 + $0x28] sm:$0xff]  ;;  %v625_v20 = vpack.c.bf16 %v45_v17, %v44_v16  ;;  %v60_v21 = vld [vmem:[%s958_s2 + $0x30] sm:$0xff]  ;;  %655 = vmatprep.subr.bf16.mxu1 %v724_v44  ;;  %v726_v45 = vmov 0.0   ;;  %vm295_vm3 = vcmask 261120  }
   0x9   :  { %69 = vperm.xlu0 %673, %v55_v14   ;;  %v61_v22 = vld [vmem:[%s958_s2 + $0x38] sm:$0xff]  ;;  %v46_v23 = vld [vmem:[%s956_s0 + $0x40] sm:$0xff]  ;;  %v47_v24 = vld [vmem:[%s956_s0 + $0x48] sm:$0xff]  ;;  %593 = vmatprep.mubr.msk.f32.mxu1 %vm725_vm2, %v726_v45 }
   0xa   :  { %v289_v25 = vld [vmem:[%s960_s4] sm:$0xff]  ;;  %v631_v27 = vpack.c.bf16 %v47_v24, %v46_v23  ;;  %v48_v28 = vld [vmem:[%s956_s0 + $0x50] sm:$0xff]  ;;  %v49_v29 = vld [vmem:[%s956_s0 + $0x58] sm:$0xff] }
   0xb   :  { %v370_v26 = vld [vmem:[%s962_s6] sm:$0xff]  ;;  %v637_v30 = vpack.c.bf16 %v49_v29, %v48_v28  ;;  %v51_v32 = vld [vmem:[%s956_s0 + $0x68] sm:$0xff]  ;;  %v52_v34 = vld [vmem:[%s956_s0 + $0x70] sm:$0xff] }
   0xc   :  { %89 = vperm.xlu1 %674, %v59_v19   ;;  %v50_v31 = vld [vmem:[%s956_s0 + $0x60] sm:$0xff]  ;;  %v53_v35 = vld [vmem:[%s956_s0 + $0x78] sm:$0xff]  ;;  %v31_v37 = vld [vmem:[%s957_s1 + $0x8] sm:$0xff] }
   0xd   :  { %618 = vmatpush3.bf16.xpose.msk.msra.mxu0 %vm785_vm1, %v613_v7  ;;  %84 = vperm.xlu0 %673, %v58_v18   ;;  %v643_v33 = vpack.c.bf16 %v51_v32, %v50_v31  ;;  %v649_v36 = vpack.c.bf16 %v53_v35, %v52_v34  ;;  %v32_v38 = vld [vmem:[%s957_s1 + $0x10] sm:$0xff]  ;;  %v33_v39 = vld [vmem:[%s957_s1 + $0x18] sm:$0xff]  ;;  %v34_v40 = vld [vmem:[%s957_s1 + $0x20] sm:$0xff] }
   0xe   :  { %621 = vmatprep.subr.msk.bf16.mxu0 %vm785_vm1, %v619_v13  ;;  %v35_v41 = vld [vmem:[%s957_s1 + $0x28] sm:$0xff]  ;;  %v36_v42 = vld [vmem:[%s957_s1 + $0x30] sm:$0xff]  ;;  %v37_v43 = vld [vmem:[%s957_s1 + $0x38] sm:$0xff] }
   0xf   :  { %v288_v10 = vld [vmem:[%s959_s3] sm:$0xff]  ;;  %s727_s3 = smov [#allocation2]  }
  0x10   :  { %99 = vperm.xlu1 %674, %v61_v22   ;;  %v369_v19 = vld [vmem:[%s961_s5] sm:$0xff]  ;;  %s459_s27 = sshll.u32 %s727_s3, 4  ;;  %s460_s27 = int_to_ptr.vmem [resolvable:$true] %s459_s27 }
  0x11   :  { %94 = vperm.xlu0 %673, %v60_v21   ;;  %s675_s4 = scalar_lea.vmem %s460_s27, 128  ;;  %p680_p1 = scmp.lt.s32.totalorder %s460_s27, %s460_s27 }
  0x12   :  { %p676_p0 = scmp.ne.s32.totalorder %s460_s27, %s675_s4  ;;  %p681_p2 = scmp.lt.s32.totalorder %s675_s4, %s675_s4 }
  0x14   :  { %373 = vperm.xlu1 %674, %v370_v26   ;;  %p682_p3 = por %p681_p2, %p680_p1 }
  0x15   :  { %624 = vmatpush3.bf16.xpose.msk.msra.mxu0 %vm785_vm1, %v619_v13  ;;  %292 = vperm.xlu0 %673, %v289_v25  }
  0x16   :  { %627 = vmatprep.subr.msk.bf16.mxu0 %vm785_vm1, %v625_v20  ;;  %p683_p4 = pnand %p682_p3, %p676_p0 }
  0x1d   :  { %630 = vmatpush3.bf16.xpose.msk.msra.mxu0 %vm785_vm1, %v625_v20 }
  0x1e   :  { %633 = vmatprep.subr.msk.bf16.mxu0 %vm785_vm1, %v631_v27 }
  0x25   :  { %636 = vmatpush3.bf16.xpose.msk.msra.mxu0 %vm785_vm1, %v631_v27 }
  0x26   :  { %639 = vmatprep.subr.msk.bf16.mxu0 %vm785_vm1, %v637_v30 }
  0x2d   :  { %642 = vmatpush3.bf16.xpose.msk.msra.mxu0 %vm785_vm1, %v637_v30 }
  0x2e   :  { %645 = vmatprep.subr.msk.bf16.mxu0 %vm785_vm1, %v643_v33 }
  0x35   :  { %648 = vmatpush3.bf16.xpose.msk.msra.mxu0 %vm785_vm1, %v643_v33 }
  0x36   :  { %651 = vmatprep.subr.msk.bf16.mxu0 %vm785_vm1, %v649_v36 }
  0x3d   :  { %654 = vmatpush3.bf16.xpose.msk.msra.mxu0 %vm785_vm1, %v649_v36 }
  0x44   :  { %574 = vmatmul.mubr.msk.f32.vlgmr.msra.gmra.mrb[0].mxu0 %vm102_vm0, %v31_v37 }
  0x45   :  { %576 = vmatprep.mubr.msk.f32.mxu0 %vm102_vm0, %v32_v38 }
  0x48   :  { %577 = vmatmul.mubr.msk.f32.gmra.mrb[2].mxu0 %vm102_vm0, %v33_v39 }
  0x49   :  { %579 = vmatprep.mubr.msk.f32.mxu0 %vm102_vm0, %v34_v40 }
  0x4c   :  { %580 = vmatmul.mubr.msk.f32.gmra.mrb[4].mxu0 %vm102_vm0, %v35_v41 }
  0x4d   :  { %582 = vmatprep.mubr.msk.f32.mxu0 %vm102_vm0, %v36_v42 }
  0x50   :  { %583 = vmatmul.mubr.msk.f32.gmra.mrb[6].mxu0 %vm102_vm0, %v37_v43 }
  0x83   :  { %v75_v47 = vpop.permute.xlu1 %74 }
  0x84   :  { %v65_v46 = vpop.permute.xlu0 %64 }
  0x87   :  { %v80_v49 = vpop.permute.xlu1 %79 }
  0x88   :  { %v70_v48 = vpop.permute.xlu0 %69 }
  0x8b   :  { %v90_v59 = vpop.permute.xlu1 %89 }
  0x8c   :  { %v85_v62 = vpop.permute.xlu0 %84 }
  0x8f   :  { %v100_v7 = vpop.permute.xlu1 %99 }
  0x90   :  { %v95_v11 = vpop.permute.xlu0 %94 }
  0x94   :  { %v293_v20 = vpop.permute.xlu0 %292 }
 0x117   :  { %v575_v50 = vpop.f32.mrb[0].mxu0 }
 0x118   :  { %v247_v51 = vadd.f32 %v575_v50, %v70_v48  ;;  %v241_v52 = vpop.f32.mrb[1].mxu0 }
 0x119   :  { %v242_v53 = vadd.f32 %v241_v52, %v65_v46 }
 0x11a   :  { %v281_v54 = vmax.f32 %v247_v51, 0.0 }
 0x11b   :  { %v280_v55 = vmax.f32 %v242_v53, 0.0  ;;  %v578_v56 = vpop.f32.mrb[2].mxu0 }
 0x11c   :  { %v257_v57 = vadd.f32 %v578_v56, %v80_v49  ;;  %v251_v58 = vpop.f32.mrb[3].mxu0 }
 0x11d   :  { %v252_v60 = vadd.f32 %v251_v58, %v75_v47  ;;  %v656_v61 = vpack.c.bf16 %v281_v54, %v280_v55 }
 0x11e   :  { %v283_v63 = vmax.f32 %v257_v57, 0.0 }
 0x11f   :  { %v282_v0 = vmax.f32 %v252_v60, 0.0  ;;  %v581_v1 = vpop.f32.mrb[4].mxu0  ;;  %657 = vmatpush3.bf16.msra.mxu1 %v656_v61 }
 0x120   :  { %v267_v2 = vadd.f32 %v581_v1, %v90_v59  ;;  %v261_v3 = vpop.f32.mrb[5].mxu0  ;;  %658 = vmatprep.subr.bf16.mxu1 %v724_v44 }
 0x121   :  { %v659_v4 = vpack.c.bf16 %v283_v63, %v282_v0  ;;  %v262_v5 = vadd.f32 %v261_v3, %v85_v62 }
 0x122   :  { %v285_v6 = vmax.f32 %v267_v2, 0.0 }
 0x123   :  { %v284_v8 = vmax.f32 %v262_v5, 0.0  ;;  %v584_v9 = vpop.f32.mrb[6].mxu0  ;;  %660 = vmatpush3.bf16.msra.mxu1 %v659_v4 }
 0x124   :  { %v277_v12 = vadd.f32 %v584_v9, %v100_v7  ;;  %v271_v13 = vpop.f32.mrb[7].mxu0  ;;  %661 = vmatprep.subr.bf16.mxu1 %v724_v44 }
 0x125   :  { %v662_v14 = vpack.c.bf16 %v285_v6, %v284_v8  ;;  %v272_v15 = vadd.f32 %v271_v13, %v95_v11 }
 0x126   :  { %v287_v16 = vmax.f32 %v277_v12, 0.0  ;;  %594 = vmatmul.mubr.msk.f32.vlgmr.msra.gmra.mrb[0].mxu1 %vm295_vm3, %v288_v10 }
 0x127   :  { %v286_v17 = vmax.f32 %v272_v15, 0.0  ;;  %663 = vmatpush3.bf16.msra.mxu1 %v662_v14  ;;  %604 = vmatprep.mubr.msk.f32.mxu1 %vm725_vm2, %v726_v45 }
 0x128   :  { %664 = vmatprep.subr.bf16.mxu1 %v724_v44 }
 0x129   :  { %v665_v18 = vpack.c.bf16 %v287_v16, %v286_v17 }
 0x12b   :  { %666 = vmatpush3.bf16.msra.mxu1 %v665_v18 }
 0x12e   :  { %605 = vmatmul.mubr.msk.f32.vlgmr.msra.gmra.mrb[2].mxu1 %vm295_vm3, %v369_v19 }
 0x1f9   :  { %v365_v21 = vpop.f32.mrb[0].mxu1 }
 0x1fa   :  { %v366_v22 = vadd.f32 %v365_v21, %v293_v20  ;;  %v595_v23 = vpop.f32.mrb[1].mxu1 }
 0x1fc   :  { %v449_v24 = vmax.f32 %v366_v22, 0.0 }
 0x1fe   :  { %450 = vst [vmem:[#allocation2] sm:$0xff] %v449_v24 }
 0x1ff   :  { %686 = shalt.err (!%p683_p4)
}
 0x200   :  { %s687_s28 = scalar_lea.hbm %s963_s7, 128 }
 0x201   :  { %p688_p5 = scmp.ne.s32.totalorder %s963_s7, %s687_s28  ;;  %p691_p6 = scmp.lt.u32.totalorder %s687_s28, %s963_s7 }
 0x203   :  { %p693_p7 = pnand %p691_p6, %p688_p5 }
 0x205   :  { %696 = shalt.err (!%p693_p7)
}
 0x206   :  { %462 = dma.vmem_to_hbm [thread:$0]  %s460_s27, 128, %s963_s7, [#allocation3]   ;;  %v374_v25 = vpop.permute.xlu1 %373  ;;  %v445_v26 = vpop.f32.mrb[2].mxu1 }
 0x207   :  { %s728_s13 = smov [#allocation4]   ;;  %v446_v27 = vadd.f32 %v445_v26, %v374_v25  ;;  %v606_v28 = vpop.f32.mrb[3].mxu1 }
 0x208   :  { %s469_s14 = sshll.u32 %s728_s13, 4  ;;  %s470_s14 = int_to_ptr.vmem [resolvable:$true] %s469_s14 }
 0x209   :  { %v451_v29 = vmax.f32 %v446_v27, 0.0  ;;  %s697_s15 = scalar_lea.vmem %s470_s14, 128  ;;  %p702_p9 = scmp.lt.s32.totalorder %s470_s14, %s470_s14 }
 0x20a   :  { %p698_p8 = scmp.ne.s32.totalorder %s470_s14, %s697_s15  ;;  %p703_p10 = scmp.lt.s32.totalorder %s697_s15, %s697_s15 }
 0x20b   :  { %452 = vst [vmem:[#allocation4] sm:$0xff] %v451_v29 }
 0x20c   :  { %p704_p11 = por %p703_p10, %p702_p9 }
 0x20e   :  { %p705_p12 = pnand %p704_p11, %p698_p8 }
 0x210   :  { %708 = shalt.err (!%p705_p12)
}
 0x211   :  { %s709_s7 = scalar_lea.hbm %s964_s8, 128 }
 0x212   :  { %p710_p13 = scmp.ne.s32.totalorder %s964_s8, %s709_s7  ;;  %p713_p0 = scmp.lt.u32.totalorder %s709_s7, %s964_s8 }
 0x214   :  { %p715_p1 = pnand %p713_p0, %p710_p13 }
 0x216   :  { %718 = shalt.err (!%p715_p1)
}
 0x217   :  { %472 = dma.vmem_to_hbm [thread:$0]  %s470_s14, 128, %s964_s8, [#allocation5]  }
 0x218   :  { %719 = dma.done.wait [#allocation3], 128  }
 0x219   :  { %720 = vsyncadd [#allocation3], 4294967168 }
 0x21a   :  { %721 = dma.done.wait [#allocation5], 128  }
 0x21b   :  { %722 = vsyncadd [#allocation5], 4294967168 }
 0x21c   :  { %479 = vsyncpa [#allocation3], 1 }
 0x21d   :  { %480 = vsyncpa [#allocation5], 1 }

</bundles_post_ra>
